<compile_context>
chip_gen: v7x
topology: tpu7x:2x2x1
jax: 0.10.0
libtpu: 0.0.40
codegen_flags: <defaults>
</compile_context>

<pallas_src>
import jax
import jax.numpy as jnp
from jax.experimental import pallas as pl
from jax.experimental.pallas import tpu as pltpu


# JPEG constants: Cb = 0.5/(1-0.114) * (B - Y) + 128 ; Cr = 0.5/(1-0.299) * (R - Y) + 128
_KB = 0.5 / 0.886   # 0.5643340857787810
_KR = 0.5 / 0.701   # 0.7132667617689016


def _rgb2ycbcr_kernel(x_ref, o_ref):
    # x_ref block: (1, 3, TH, W) in the input's native dtype; cast in-kernel.
    # o_ref block: (1, 3, TH, W) float output; channel planes stay lane-dense.
    r = x_ref[0, 0].astype(jnp.float32)
    g = x_ref[0, 1].astype(jnp.float32)
    b = x_ref[0, 2].astype(jnp.float32)

    y = 0.299 * r + 0.587 * g + 0.114 * b          # 5 VALU ops
    cb = _KB * (b - y) + 128.0                     # 3 VALU ops
    cr = _KR * (r - y) + 128.0                     # 3 VALU ops

    o_ref[0, 0] = y.astype(o_ref.dtype)
    o_ref[0, 1] = cb.astype(o_ref.dtype)
    o_ref[0, 2] = cr.astype(o_ref.dtype)


def _sublane_multiple(itemsize):
    # Sub-32-bit dtypes pack along sublanes: bf16 rows travel in pairs, int8 in quads.
    return {1: 32, 2: 16}.get(itemsize, 8)


def _vmem_block_budget():
    """Per-generation budget for the (double-buffered in + out) block bytes."""
    try:
        cap = pltpu.get_tpu_info().vmem_capacity_bytes
        if cap:
            # ~1/4 of physical VMEM, clamped: 24 MiB on v5e/v6e (128 MiB phys),
            # 16 MiB on v7x (64 MiB phys).
            return max(8 << 20, min(24 << 20, cap // 4))
    except Exception:
        pass
    return 12 << 20  # conservative: fits every generation's scoped default


def _pick_row_tile(h, w, in_itemsize, out_itemsize, vmem_budget, min_row_steps=4):
    """Row tile TH: sublane-multiple, VMEM-budgeted, and small enough that the
    row grid axis gets >= min_row_steps steps where H allows (pipelining +
    megacore).  Partial edge blocks are handled by cdiv grids + masking."""
    sub = max(_sublane_multiple(in_itemsize), _sublane_multiple(out_itemsize))
    if h <= sub:
        return h  # full-dim escape from the sublane-multiple rule

    # Bytes per row of the double-buffered input + output blocks.
    per_row = 3 * w * (in_itemsize + out_itemsize) * 2
    cap = max(sub, (vmem_budget // per_row) // sub * sub)

    # Aim for at least `min_row_steps` steps along the row axis.
    want = -(-h // min_row_steps)                 # ceil(h / min_row_steps)
    want = max(sub, ((want + sub - 1) // sub) * sub)

    th = min(cap, want, (h // sub) * sub)
    return max(th, sub)


def rgb_to_ycbcr_jpeg(image, *, planar=False):
    """image: (B, 3, H, W) RGB in [0, 255] (any real dtype).

    Returns (B, H, W, 3) YCbCr (JPEG standard) by default, matching the
    PyTorch module.  With planar=True, returns (B, 3, H, W) and skips the
    final layout-change pass (preferred for downstream DiffJPEG stages).
    """
    B, C, H, W = image.shape
    assert C == 3, "expected RGB input with 3 channels"

    out_dtype = jnp.result_type(image.dtype, jnp.float32)
    in_it = jnp.dtype(image.dtype).itemsize
    out_it = jnp.dtype(out_dtype).itemsize

    budget = _vmem_block_budget()
    th = _pick_row_tile(H, W, in_it, out_it, budget)
    grid = (B, pl.cdiv(H, th))

    # Actual double-buffered block footprint + headroom (stays well under every
    # generation's physical VMEM; fixes the v5e 16 MiB scoped-default overflow).
    block_bytes = 2 * 3 * th * W * (in_it + out_it)
    vmem_limit = min(48 << 20, max(16 << 20, int(block_bytes * 1.5)))

    planar_out = pl.pallas_call(
        _rgb2ycbcr_kernel,
        out_shape=jax.ShapeDtypeStruct((B, 3, H, W), out_dtype),
        grid_spec=pltpu.PrefetchScalarGridSpec(
            num_scalar_prefetch=0,
            grid=grid,
            in_specs=[pl.BlockSpec((1, 3, th, W), lambda bi, ri: (bi, 0, ri, 0))],
            out_specs=pl.BlockSpec((1, 3, th, W), lambda bi, ri: (bi, 0, ri, 0)),
        ),
        compiler_params=pltpu.CompilerParams(
            dimension_semantics=("parallel", "parallel"),
            vmem_limit_bytes=vmem_limit,
        ),
        cost_estimate=pl.CostEstimate(
            flops=11 * B * H * W,
            transcendentals=0,
            bytes_accessed=B * 3 * H * W * (in_it + out_it),
        ),
    )(image)

    if planar:
        return planar_out
    # Explicit layout change to match the module's channels-last output.  This
    # is one extra HBM read+write pass; callers that can consume planar data
    # should use planar=True instead.
    return jnp.transpose(planar_out, (0, 2, 3, 1))


def _reference(image):
    """Pure-JAX reference mirroring the PyTorch module (exact matrix)."""
    matrix = jnp.array(
        [[0.299, 0.587, 0.114],
         [-0.168736, -0.331264, 0.5],
         [0.5, -0.418688, -0.081312]], dtype=jnp.float32).T
    shift = jnp.array([0.0, 128.0, 128.0], dtype=jnp.float32)
    nhwc = jnp.transpose(image.astype(jnp.float32), (0, 2, 3, 1))
    return jnp.tensordot(nhwc, matrix, axes=1) + shift


if __name__ == "__main__":
    key = jax.random.PRNGKey(0)
    B, H, W = 2, 16, 16
    image = jax.random.uniform(key, (B, 3, H, W), dtype=jnp.float32) * 255.0

    out = rgb_to_ycbcr_jpeg(image)
    out = jax.block_until_ready(out)

    ref = _reference(image)
    assert out.shape == (B, H, W, 3), out.shape
    assert jnp.allclose(out, ref, atol=1e-3), float(jnp.max(jnp.abs(out - ref)))

    # Planar fast path (same kernel, no trailing layout pass) must agree.
    out_planar = jax.block_until_ready(rgb_to_ycbcr_jpeg(image, planar=True))
    assert out_planar.shape == (B, 3, H, W)
    assert jnp.allclose(jnp.transpose(out_planar, (0, 2, 3, 1)), ref, atol=1e-3)

    print("KERNEL_OK")
</pallas_src>

<mosaic_0001>
module attributes {stable_mosaic.version = 11 : i64} {
  func.func @_rgb2ycbcr_kernel(%arg0: i32, %arg1: i32, %arg2: memref<1x3x8x16xf32, #tpu.memory_space<vmem>>, %arg3: memref<1x3x8x16xf32, #tpu.memory_space<vmem>>) attributes {dimension_semantics = [#tpu.dimension_semantics<parallel>, #tpu.dimension_semantics<parallel>], iteration_bounds = array<i64: 2, 2>, scalar_prefetch = 0 : i64, scratch_operands = 0 : i64, tpu.core_type = #tpu.core_type<tc>, window_params = [{transform_indices = @transform_0, window_bounds = array<i64: 1, 3, 8, 16>}, {transform_indices = @transform_1, window_bounds = array<i64: 1, 3, 8, 16>}]} {
    %c0 = arith.constant 0 : index
    %c0_0 = arith.constant 0 : index
    %c0_1 = arith.constant 0 : index
    %c0_2 = arith.constant 0 : index
    %0 = vector.load %arg2[%c0, %c0_0, %c0_1, %c0_2] : memref<1x3x8x16xf32, #tpu.memory_space<vmem>>, vector<1x1x8x16xf32>
    %1 = vector.shape_cast %0 : vector<1x1x8x16xf32> to vector<8x16xf32>
    %c0_3 = arith.constant 0 : index
    %c1 = arith.constant 1 : index
    %c0_4 = arith.constant 0 : index
    %c0_5 = arith.constant 0 : index
    %2 = vector.load %arg2[%c0_3, %c1, %c0_4, %c0_5] : memref<1x3x8x16xf32, #tpu.memory_space<vmem>>, vector<1x1x8x16xf32>
    %3 = vector.shape_cast %2 : vector<1x1x8x16xf32> to vector<8x16xf32>
    %c0_6 = arith.constant 0 : index
    %c2 = arith.constant 2 : index
    %c0_7 = arith.constant 0 : index
    %c0_8 = arith.constant 0 : index
    %4 = vector.load %arg2[%c0_6, %c2, %c0_7, %c0_8] : memref<1x3x8x16xf32, #tpu.memory_space<vmem>>, vector<1x1x8x16xf32>
    %5 = vector.shape_cast %4 : vector<1x1x8x16xf32> to vector<8x16xf32>
    %cst = arith.constant 2.990000e-01 : f32
    %6 = vector.broadcast %cst : f32 to vector<8x16xf32>
    %7 = arith.mulf %6, %1 : vector<8x16xf32>
    %cst_9 = arith.constant 5.870000e-01 : f32
    %8 = vector.broadcast %cst_9 : f32 to vector<8x16xf32>
    %9 = arith.mulf %8, %3 : vector<8x16xf32>
    %10 = arith.addf %7, %9 : vector<8x16xf32>
    %cst_10 = arith.constant 1.140000e-01 : f32
    %11 = vector.broadcast %cst_10 : f32 to vector<8x16xf32>
    %12 = arith.mulf %11, %5 : vector<8x16xf32>
    %13 = arith.addf %10, %12 : vector<8x16xf32>
    %14 = arith.subf %5, %13 : vector<8x16xf32>
    %cst_11 = arith.constant 0.564334095 : f32
    %15 = vector.broadcast %cst_11 : f32 to vector<8x16xf32>
    %16 = arith.mulf %15, %14 : vector<8x16xf32>
    %cst_12 = arith.constant 1.280000e+02 : f32
    %17 = vector.broadcast %cst_12 : f32 to vector<8x16xf32>
    %18 = arith.addf %16, %17 : vector<8x16xf32>
    %19 = arith.subf %1, %13 : vector<8x16xf32>
    %cst_13 = arith.constant 0.713266789 : f32
    %20 = vector.broadcast %cst_13 : f32 to vector<8x16xf32>
    %21 = arith.mulf %20, %19 : vector<8x16xf32>
    %cst_14 = arith.constant 1.280000e+02 : f32
    %22 = vector.broadcast %cst_14 : f32 to vector<8x16xf32>
    %23 = arith.addf %21, %22 : vector<8x16xf32>
    %c0_15 = arith.constant 0 : index
    %c0_16 = arith.constant 0 : index
    %c0_17 = arith.constant 0 : index
    %c0_18 = arith.constant 0 : index
    %24 = vector.load %arg3[%c0_15, %c0_16, %c0_17, %c0_18] : memref<1x3x8x16xf32, #tpu.memory_space<vmem>>, vector<1x1x8x16xf32>
    %25 = vector.shape_cast %24 : vector<1x1x8x16xf32> to vector<8x16xf32>
    %26 = vector.shape_cast %13 : vector<8x16xf32> to vector<1x1x8x16xf32>
    tpu.vector_store %arg3[%c0_15, %c0_16, %c0_17, %c0_18], %26 {strides = array<i32>} : memref<1x3x8x16xf32, #tpu.memory_space<vmem>>, vector<1x1x8x16xf32>,
    %c0_19 = arith.constant 0 : index
    %c1_20 = arith.constant 1 : index
    %c0_21 = arith.constant 0 : index
    %c0_22 = arith.constant 0 : index
    %27 = vector.load %arg3[%c0_19, %c1_20, %c0_21, %c0_22] : memref<1x3x8x16xf32, #tpu.memory_space<vmem>>, vector<1x1x8x16xf32>
    %28 = vector.shape_cast %27 : vector<1x1x8x16xf32> to vector<8x16xf32>
    %29 = vector.shape_cast %18 : vector<8x16xf32> to vector<1x1x8x16xf32>
    tpu.vector_store %arg3[%c0_19, %c1_20, %c0_21, %c0_22], %29 {strides = array<i32>} : memref<1x3x8x16xf32, #tpu.memory_space<vmem>>, vector<1x1x8x16xf32>,
    %c0_23 = arith.constant 0 : index
    %c2_24 = arith.constant 2 : index
    %c0_25 = arith.constant 0 : index
    %c0_26 = arith.constant 0 : index
    %30 = vector.load %arg3[%c0_23, %c2_24, %c0_25, %c0_26] : memref<1x3x8x16xf32, #tpu.memory_space<vmem>>, vector<1x1x8x16xf32>
    %31 = vector.shape_cast %30 : vector<1x1x8x16xf32> to vector<8x16xf32>
    %32 = vector.shape_cast %23 : vector<8x16xf32> to vector<1x1x8x16xf32>
    tpu.vector_store %arg3[%c0_23, %c2_24, %c0_25, %c0_26], %32 {strides = array<i32>} : memref<1x3x8x16xf32, #tpu.memory_space<vmem>>, vector<1x1x8x16xf32>,
    return
  }
  func.func @transform_0(%arg0: i32, %arg1: i32) -> (i32, i32, i32, i32) {
    %c0_i32 = arith.constant 0 : i32
    %c0_i32_0 = arith.constant 0 : i32
    %c0_i32_1 = arith.constant 0 : i32
    return %arg0, %c0_i32, %arg1, %c0_i32_0 : i32, i32, i32, i32
  }
  func.func @transform_1(%arg0: i32, %arg1: i32) -> (i32, i32, i32, i32) {
    %c0_i32 = arith.constant 0 : i32
    %c0_i32_0 = arith.constant 0 : i32
    %c0_i32_1 = arith.constant 0 : i32
    return %arg0, %c0_i32, %arg1, %c0_i32_0 : i32, i32, i32, i32
  }
}

</mosaic_0001>

<bundles_post_ra>
// kernel: tpu_custom_call.1
= control target key start
LH: loop header
LB: loop body
LE: loop exit
PB: predicated region body
PF: predicated region fallthrough
CT: control target
= control target key end

     0   :  { %6 = vsyncpa [#allocation3], 0  ;;  %s724_s0 = inlined_call_operand.hbm [shape: f32[2,3,16,16], index: 0, kind: input, shape index: {}]   ;;  %s725_s1 = inlined_call_operand.hbm [shape: f32[2,3,16,16], index: 1, kind: output, shape index: {}]  }
   0x1   :  { %8 = vsyncpa [#allocation3 + $0x1], 0 }
   0x2   :  { %9 = vsyncpa [#allocation4], 0 }
   0x3   :  { %11 = vsyncpa [#allocation4 + $0x1], 0  ;;  %s526_s6 = smov 0   ;;  %s528_s7 = smov 0  }
   0x4   :  { %s530_s8 = smov 0   ;;  %s532_s9 = smov 0  }
   0x5   :  { %s534_s10 = smov 0   ;;  %s536_s11 = smov 0  }
   0x6   :  { %s538_s12 = smov 0   ;;  %s540_s13 = smov 0  }
   0x7 LB: > { %s277_s14 = sadd.s32 4294967295, %s506_s13   ;;  %s278_s15 = sadd.s32 4294967294, %s506_s13   ;;  %s506_s13 = sphi %s540_s13, %s17_s13   ;;  %s502_s12 = sphi %s538_s12, %s740_s12   ;;  %s498_s11 = sphi %s536_s11, %s739_s11   ;;  %s494_s10 = sphi %s534_s10, %s738_s10   ;;  %s490_s9 = sphi %s532_s9, %s737_s9   ;;  %s486_s8 = sphi %s530_s8, %s736_s8   ;;  %s482_s7 = sphi %s528_s7, %s735_s7   ;;  %s478_s6 = sphi %s526_s6, %s734_s6  }
   0x8   : > { %s26_s16 = sadd.s32 1, %s498_s11  ;;  %s29_s17 = sadd.s32 1, %s502_s12 }
   0x9   : > { %p27_p0 = scmp.ge.s32.totalorder %s26_s16, 2  ;;  %s38_s18 = sadd.s32 1, %s486_s8 }
   0xa   : > { %p45_p1 = scmp.ne.s32.totalorder %s486_s8, %s482_s7  ;;  %p46_p2 = scmp.eq.s32.totalorder %s506_s13, 0 }
   0xb   : > { %s742_s16 = smov (%p27_p0, %s26_s16), 0  ;;  %s744_s17 = smov (!%p27_p0, %s29_s17), %s502_s12 }
   0xc   : > { %s34_s19 = ssub.s32 %s498_s11, %s742_s16  ;;  %p579_p3 = por %p46_p2, %p45_p1 }
   0xd   : > { %p31_p4 = scmp.ge.s32.totalorder %s744_s17, 2  ;;  %p51_p5 = scmp.ne.s32.totalorder %s482_s7, %s478_s6 }
   0xe   : > { %p52_p6 = scmp.eq.s32.totalorder %s277_s14, 0  ;;  %p77_p7 = scmp.eq.s32.totalorder %s277_s14, 3 }
   0xf   : > { %s746_s17 = smov (%p31_p4, %s744_s17), 0  ;;  %p83_p10 = scmp.eq.s32.totalorder %s278_s15, 3 }
  0x10   : > { %p587_p8 = por %p52_p6, %p51_p5  ;;  %p591_p9 = por %p77_p7, %p45_p1 }
  0x11   : > { %s33_s23 = ssub.s32 %s502_s12, %s746_s17  ;;  %p597_p12 = por %p83_p10, %p51_p5 }
  0x12   : > { %s729_s22 = scalar_select %p591_p9, 1, 0 }
  0x13   : > { %s35_s24 = sor.u32 %s34_s19, %s33_s23  ;;  %p306_p13 = scmp.lt.s32.totalorder %s506_s13, 4 }
  0x14   : > { %p36_p11 = scmp.eq.s32.totalorder %s35_s24, 0  ;;  %s103_s26 = sand.u32 1, %s486_s8  }
  0x15   : > { %s730_s25 = scalar_select %p597_p12, 1, 0 }
  0x16   : > { %s604_s27 = scalar_select %p36_p11, %s486_s8, %s38_s18  }
  0x17   : > { %s290_s28 = smul.u32 24, %s103_s26  ;;  %p609_p0 = pnand %p306_p13, %p579_p3 }
  0x18   : > { %s291_s29 = smul.u32 6, %s502_s12  ;;  %s621_s19 = scalar_lea.sflag [#allocation3], %s103_s26 }
  0x19   : > { %s107_s3 = scalar_lea.vmem [#allocation2], %s290_s28  ;;  %p380_p2 = pneg %p609_p0 }
  0x1a   : > { %s112_s2 = sadd.s32 %s498_s11, %s291_s29  ;;  %s115_s4 = sshll.u32 %s107_s3, 4  ;;  %s614_s4 = int_to_ptr.vmem [resolvable:$true] %s115_s4 }
  0x1b   : > { %s281_s5 = sshll.u32 %s112_s2, 7  ;;  %s383_s28 = scalar_lea.hbm %s724_s0, 1536 }
  0x1c   : > { %s619_s18 = scalar_lea.hbm %s724_s0, %s281_s5 }
  0x1d   : > { %s378_s20 = scalar_lea.hbm %s619_s18, 384  ;;  %p384_p5 = scmp.lt.u32.totalorder %s619_s18, %s724_s0 }
  0x1e   : > { %p379_p1 = scmp.ne.s32.totalorder %s619_s18, %s378_s20  ;;  %p385_p6 = scmp.lt.u32.totalorder %s383_s28, %s378_s20 }
  0x1f   : > { %p387_p10 = scmp.lt.u32.totalorder %s378_s20, %s619_s18 }
  0x20   : > { %p381_p3 = pnand %p380_p2, %p379_p1  ;;  %p386_p7 = por %p385_p6, %p384_p5 }
  0x22   : > { %p382_p4 = pneg %p381_p3  ;;  %p388_p11 = por %p387_p10, %p386_p7 }
  0x24   : > { %p389_p13 = pnand %p388_p11, %p382_p4 }
  0x26   : > { %392 = shalt.err (!%p389_p13)
}
  0x27   : > { %s393_s26 = scalar_lea.vmem %s614_s4, 384  ;;  %s508_s3 = smov [#allocation2]  }
  0x28   : > { %p394_p1 = scmp.ne.s32.totalorder %s614_s4, %s393_s26  ;;  %s398_s5 = sshll.u32 %s508_s3, 4  ;;  %s399_s5 = int_to_ptr.vmem [resolvable:$false] %s398_s5 }
  0x29   : > { %s400_s14 = scalar_lea.vmem %s399_s5, 768  ;;  %p401_p9 = scmp.lt.s32.totalorder %s614_s4, %s399_s5 }
  0x2a   : > { %p396_p3 = pnand %p394_p1, %p380_p2  ;;  %p402_p5 = scmp.lt.s32.totalorder %s400_s14, %s393_s26 }
  0x2c   : > { %p397_p12 = pneg %p396_p3  ;;  %p403_p6 = por %p402_p5, %p401_p9 }
  0x2e   : > { %p404_p7 = pnand %p403_p6, %p397_p12 }
  0x30   : > { %407 = shalt.err (!%p404_p7)
}
  0x31   : > { %s509_s15 = smov 256   ;;  %s510_s20 = smov 128  }
  0x32   : > { %s511_s23 = smov 8   ;;  %p282_p2 = scmp.ge.s32.totalorder %s506_s13, 1 }
  0x33   : > { %301 = dma.hbm_to_vmem [thread:$0]  (!%p609_p0), %s619_s18, 384, %s614_s4, %s621_s19, %s509_s15, %s510_s20, %s511_s23  }
  0x34   : > { %p123_p4 = scmp.lt.s32.totalorder %s506_s13, 5 }
  0x36   : > { %p124_p10 = pnand %p282_p2, %p123_p4 }
  0x37   : > { %s652_s24 = sand.u32 (!%p124_p10), 1, %s482_s7  }
  0x38   : > { %127 = sbr.rel (%p124_p10) target bundleno = 93 (0x5d), region = 24  ;;  %s130_s29 = scalar_lea.sflag (!%p124_p10), [#allocation3], %s652_s24 }
  0x39   : > { %s292_s28 = smul.u32 (!%p124_p10), 24, %s652_s24 }
  0x3b   : > { %s133_s2 = scalar_lea.vmem (!%p124_p10), [#allocation2], %s292_s28 }
  0x3f   : > { %469 = dma.done.wait (%p587_p8), %s130_s29, 384  }
  0x40   : > { %471 = vsyncadd (%p587_p8), %s130_s29, 4294966912  ;;  %v152_v0 = vld [vmem:[%s133_s2] sm:$0xff]  ;;  %v283_v1 = vld [vmem:[%s133_s2 + $0x8] sm:$0xff]  ;;  %s293_s30 = smul.u32 6, %s494_s10  ;;  %vm168_vm0 = vcmask 130048   ;;  %s151_s18 = scalar_lea.vmem [#allocation5], %s292_s28 }
  0x41   : > { %v284_v2 = vld [vmem:[%s133_s2 + $0x10] sm:$0xff]  ;;  %v157_v3 = vmul.f32 0.299, %v152_v0  ;;  %v158_v4 = vmul.f32 0.587, %v283_v1  ;;  %s189_s19 = sshll.u32 %s151_s18, 4  ;;  %s663_s19 = int_to_ptr.vmem [resolvable:$true] %s189_s19 }
  0x42   : > { %v160_v5 = vmul.f32 0.114, %v284_v2  ;;  %s186_s4 = sadd.s32 %s490_s9, %s293_s30  ;;  %s175_s3 = scalar_lea.sflag [#allocation4], %s652_s24 }
  0x43   : > { %v159_v6 = vadd.f32 %v158_v4, %v157_v3  ;;  %s287_s21 = sshll.u32 %s186_s4, 7  ;;  %s408_s5 = scalar_lea.vmem %s663_s19, 384 }
  0x44   : > { %s668_s9 = scalar_lea.hbm %s725_s1, %s287_s21  ;;  %p409_p8 = scmp.ne.s32.totalorder %s663_s19, %s408_s5 }
  0x45   : > { %v161_v7 = vadd.f32 %v160_v5, %v159_v6  ;;  %p732_p9 = scmp.ne.s32.totalorder %s729_s22, 0  ;;  %s512_s14 = smov [#allocation5]  }
  0x46   : > { %s412_s15 = sshll.u32 %s512_s14, 4  ;;  %s413_s15 = int_to_ptr.vmem [resolvable:$false] %s412_s15 }
  0x47   : > { %169 = vst.msk [vmem:[%s151_s18] sm:$0xff] %vm168_vm0, %v161_v7  ;;  %v162_v8 = vsub.f32 %v284_v2, %v161_v7  ;;  %v165_v9 = vsub.f32 %v152_v0, %v161_v7  ;;  %p410_p12 = pnand %p409_p8, %p732_p9  ;;  %s414_s20 = scalar_lea.vmem %s413_s15, 768 }
  0x48   : > { %p415_p11 = scmp.lt.s32.totalorder %s663_s19, %s413_s15  ;;  %p416_p13 = scmp.lt.s32.totalorder %s414_s20, %s408_s5 }
  0x49   : > { %v163_v10 = vmul.f32 0.5643341, %v162_v8  ;;  %v166_v11 = vmul.f32 0.7132668, %v165_v9  ;;  %p411_p0 = pneg %p410_p12 }
  0x4a   : > { %p417_p1 = por %p416_p13, %p415_p11 }
  0x4b   : > { %v164_v12 = vadd.f32 128.0, %v163_v10  ;;  %v167_v13 = vadd.f32 128.0, %v166_v11 }
  0x4c   : > { %p418_p3 = pnand %p417_p1, %p411_p0 }
  0x4d   : > { %285 = vst.msk [vmem:[%s151_s18 + $0x8] sm:$0xff] %vm168_vm0, %v164_v12  ;;  %286 = vst.msk [vmem:[%s151_s18 + $0x10] sm:$0xff] %vm168_vm0, %v167_v13 }
  0x4e   : > { %421 = shalt.err (!%p418_p3)
}
  0x4f   : > { %s422_s23 = scalar_lea.hbm %s668_s9, 384  ;;  %s426_s2 = scalar_lea.hbm %s725_s1, 1536 }
  0x50   : > { %p423_p5 = scmp.ne.s32.totalorder %s668_s9, %s422_s23  ;;  %p427_p2 = scmp.lt.u32.totalorder %s668_s9, %s725_s1 }
  0x51   : > { %p428_p4 = scmp.lt.u32.totalorder %s426_s2, %s422_s23  ;;  %p430_p8 = scmp.lt.u32.totalorder %s422_s23, %s668_s9 }
  0x52   : > { %p424_p6 = pnand %p423_p5, %p732_p9 }
  0x53   : > { %p429_p10 = por %p428_p4, %p427_p2 }
  0x54   : > { %p425_p7 = pneg %p424_p6 }
  0x55   : > { %p431_p12 = por %p430_p8, %p429_p10 }
  0x57   : > { %p432_p0 = pnand %p431_p12, %p425_p7 }
  0x59   : > { %435 = shalt.err (!%p432_p0)
}
  0x5a   : > { %s513_s18 = smov 128   ;;  %s514_s21 = smov 256  }
  0x5b   : > { %s515_s10 = smov 8  }
  0x5c   : > { %296 = dma.vmem_to_hbm [thread:$0]  (%p732_p9), %s663_s19, 384, %s668_s9, %s175_s3, %s513_s18, %s514_s21, %s515_s10  }
  0x5d PF: > { %p307_p11 = scmp.ge.s32.totalorder %s506_s13, 2  ;;  %s204_s26 = sand.u32 1, %s478_s6  }
  0x5e   : > { %p733_p13 = scmp.ne.s32.totalorder %s730_s25, 0  ;;  %s205_s5 = scalar_lea.sflag [#allocation4], %s204_s26 }
  0x60   : > { %p303_p1 = pnand %p307_p11, %p733_p13 }
  0x62   : > { %473 = dma.done.wait (!%p303_p1), %s205_s5, 384  }
  0x63   : > { %475 = vsyncadd (!%p303_p1), %s205_s5, 4294966912  ;;  %s17_s13 = sadd.s32 1, %s506_s13   ;;  %s734_s6 = smov %s482_s7 }
  0x64   : > { %p14_p3 = scmp.ge.s32.totalorder %s17_s13, 6   ;;  %s735_s7 = smov %s486_s8 }
  0x65   : > { %s736_s8 = smov %s604_s27  ;;  %s737_s9 = smov %s498_s11 }
  0x66   : > { %s738_s10 = smov %s502_s12  ;;  %s739_s11 = smov %s742_s16 }
  0x67   : > { %s740_s12 = smov %s746_s17  ;;  %16 = sbr.rel (!%p14_p3) target bundleno = 7 (0x7), region = 73 }
  0x6e   :  { %210 = vsyncpa [#allocation3], 1 }
  0x6f   :  { %212 = vsyncpa [#allocation3 + $0x1], 1 }
  0x70   :  { %213 = vsyncpa [#allocation4], 1 }
  0x71   :  { %215 = vsyncpa [#allocation4 + $0x1], 1 }

</bundles_post_ra>
